<compile_context>
chip_gen: v7x
topology: tpu7x:2x2x1
jax: 0.10.0
libtpu: 0.0.40
codegen_flags: <defaults>
</compile_context>

<pallas_src>
import functools

import numpy as np

import jax
import jax.numpy as jnp
from jax.experimental import pallas as pl
from jax.experimental.pallas import tpu as pltpu


def _focal_kernel(*refs, num_class, gamma, smooth, n_pix, tile_s, has_alpha, needs_mask):
    if has_alpha:
        logit_ref, tgt_ref, alpha_ref, acc_ref = refs
    else:
        logit_ref, tgt_ref, acc_ref = refs
        alpha_ref = None

    l_idx = pl.program_id(1)

    # Per-image accumulator (resident output block) init on the first spatial tile.
    @pl.when(l_idx == 0)
    def _():
        acc_ref[...] = jnp.zeros_like(acc_ref)

    x = logit_ref[...].astype(jnp.float32)          # (1, C, TS, 128)
    tgt = tgt_ref[...]                              # (1, 1, TS, 128) int32

    # Numerically stable softmax pieces; the class axis is the leading axis, so these
    # reductions are cheap elementwise ops over C vreg-slabs (no cross-lane work).
    m = jnp.max(x, axis=1, keepdims=True)           # (1, 1, TS, 128)
    e = jnp.exp(x - m)                              # (1, C, TS, 128)
    s = jnp.sum(e, axis=1, keepdims=True)           # (1, 1, TS, 128)

    cls = jax.lax.broadcasted_iota(jnp.int32, x.shape, 1)
    is_t = cls == tgt                               # target one-hot mask, (1, C, TS, 128)
    e_t = jnp.sum(jnp.where(is_t, e, 0.0), axis=1, keepdims=True)   # exp at target class

    # Smoothed one-hot gather in closed form:
    #   sum(clip(one_hot, lo, hi) * softmax) = (hi*e_t + lo*(s - e_t)) / s
    # NOTE: lo is undefined for num_class == 1 (same as the PyTorch reference).
    lo = smooth / (num_class - 1)
    hi = 1.0 - smooth
    inv_s = pl.reciprocal(s, approx=False)          # one divide per pixel, not per class
    pt = (hi * e_t + lo * (s - e_t)) * inv_s + smooth
    logpt = jnp.log(pt)

    if has_alpha:
        alpha_b = alpha_ref[...].astype(jnp.float32)            # (1, C, 1, 128)
        a = jnp.sum(jnp.where(is_t, alpha_b, 0.0), axis=1, keepdims=True)
    else:
        a = 1.0                                                  # alpha=None -> ones

    omp = 1.0 - pt
    if gamma == 2.0:
        focal = omp * omp            # VPU mul; avoids exp(gamma*log(.)) and its NaN hazard
    elif gamma == 1.0:
        focal = omp
    elif gamma == 0.0:
        focal = jnp.ones_like(omp)
    else:
        focal = jnp.power(jnp.maximum(omp, 0.0), gamma)

    loss = (-a) * focal * logpt                                  # (1, 1, TS, 128)

    if needs_mask:
        # Zero out the spatial padding (pixels >= H*W for this image).
        row = jax.lax.broadcasted_iota(jnp.int32, loss.shape, 2)
        col = jax.lax.broadcasted_iota(jnp.int32, loss.shape, 3)
        pix = (l_idx * tile_s + row) * 128 + col
        loss = jnp.where(pix < n_pix, loss, 0.0)

    # Per-lane partial sums: (1,1,TS,128) -> (1, TS//8, 8, 128) -> elementwise adds of
    # full vregs; only the wrapper does the final scalar reduction.
    part = jnp.sum(loss.reshape(1, tile_s // 8, 8, 128), axis=1)  # (1, 8, 128)
    acc_ref[...] = acc_ref[...] + part


def _choose_tile_s(num_class, s_rows, itemsize):
    """Pick the number of 128-pixel sublane rows per tile (~4 MiB of logits/block)."""
    budget = 4 * 1024 * 1024
    ts = budget // max(1, num_class * 128 * itemsize)
    ts = max(8, min(1024, (ts // 8) * 8))
    s_rounded = ((s_rows + 7) // 8) * 8
    return max(8, min(ts, s_rounded))


@functools.partial(jax.jit, static_argnames=("gamma", "smooth", "size_average", "tile_s"))
def _segment_focal_loss_impl(logit, mask, alpha_vec, *, gamma, smooth, size_average, tile_s):
    N, C = logit.shape[0], logit.shape[1]
    L = int(np.prod(logit.shape[2:]))                 # pixels per image (H*W*...)
    S = -(-L // 128)                                  # 128-pixel rows per image
    itemsize = jnp.dtype(logit.dtype).itemsize

    ts = _choose_tile_s(C, S, itemsize) if tile_s is None else int(tile_s)
    S_pad = ((S + ts - 1) // ts) * ts
    L_pad = S_pad * 128
    needs_mask = L_pad != L

    # Free reshapes of the native NCHW layout (no transpose, no extra HBM round trip).
    logit3 = logit.reshape(N, C, L)
    tgt3 = mask.reshape(N, 1, L).astype(jnp.int32)
    if needs_mask:
        logit3 = jnp.pad(logit3, ((0, 0), (0, 0), (0, L_pad - L)))
        tgt3 = jnp.pad(tgt3, ((0, 0), (0, 0), (0, L_pad - L)))
    logit4 = logit3.reshape(N, C, S_pad, 128)
    tgt4 = tgt3.reshape(N, 1, S_pad, 128)

    has_alpha = alpha_vec is not None

    kernel = functools.partial(
        _focal_kernel,
        num_class=C, gamma=float(gamma), smooth=float(smooth),
        n_pix=L, tile_s=ts, has_alpha=has_alpha, needs_mask=needs_mask)

    in_specs = [
        pl.BlockSpec((1, C, ts, 128), lambda n, l: (n, 0, l, 0)),
        pl.BlockSpec((1, 1, ts, 128), lambda n, l: (n, 0, l, 0)),
    ]
    args = [logit4, tgt4]
    if has_alpha:
        alpha4 = jnp.broadcast_to(
            alpha_vec.astype(jnp.float32).reshape(1, C, 1, 1), (1, C, 1, 128))
        in_specs.append(pl.BlockSpec((1, C, 1, 128), lambda n, l: (0, 0, 0, 0)))
        args.append(alpha4)

    partial_sums = pl.pallas_call(
        kernel,
        out_shape=jax.ShapeDtypeStruct((N, 8, 128), jnp.float32),
        grid_spec=pltpu.PrefetchScalarGridSpec(
            num_scalar_prefetch=0,
            grid=(N, S_pad // ts),
            in_specs=in_specs,
            out_specs=pl.BlockSpec((1, 8, 128), lambda n, l: (n, 0, 0)),
        ),
        compiler_params=pltpu.CompilerParams(
            # N axis is independent -> megacore split on v7x; spatial axis carries the
            # resident accumulator, so it must stay "arbitrary".
            dimension_semantics=("parallel", "arbitrary")),
    )(*args)

    total = jnp.sum(partial_sums)
    if size_average:
        return total / jnp.float32(N * L)
    return total


def _prepare_alpha(alpha, num_class, balance_index):
    """Mirror the PyTorch alpha handling. Returns None (== all-ones) or a (C,) array."""
    if alpha is None:
        return None                                   # ones -> skip the gather entirely
    if isinstance(alpha, (list, tuple, np.ndarray)):
        a = np.asarray(alpha, dtype=np.float32).reshape(-1)
        assert a.shape[0] == num_class
        a = a / a.sum()
        return jnp.asarray(a)
    if isinstance(alpha, float):
        a = np.full((num_class,), 1.0 - alpha, dtype=np.float32)
        a[balance_index] = alpha
        return jnp.asarray(a)
    raise TypeError("Not support alpha type")


def segment_focal_loss(logit, mask, alpha=None, gamma=2.0, balance_index=0,
                       smooth=1e-5, size_average=True, tile_s=None):
    """logit: (N, C, *spatial) float; mask: (N, 1, *spatial) int labels."""
    if smooth is not None and (smooth < 0 or smooth > 1.0):
        raise ValueError('smooth value should be in [0,1]')
    num_class = logit.shape[1]
    alpha_vec = _prepare_alpha(alpha, num_class, balance_index)
    # TODO(synk): apply_nonlin (arbitrary user callable on the softmax output) is not
    # translated; the module default (None) is what is implemented here.
    return _segment_focal_loss_impl(
        logit, mask, alpha_vec,
        gamma=float(gamma), smooth=float(smooth),
        size_average=bool(size_average), tile_s=tile_s)


def _reference(logit, mask, alpha, gamma=2.0, smooth=1e-5, balance_index=0,
               size_average=True):
    """Pure-JAX reference mirroring the PyTorch forward."""
    N, C = logit.shape[0], logit.shape[1]
    p = jax.nn.softmax(logit.astype(jnp.float32), axis=1)
    p = jnp.transpose(p.reshape(N, C, -1), (0, 2, 1)).reshape(-1, C)
    t = mask.reshape(-1).astype(jnp.int32)
    if alpha is None:
        a_vec = jnp.ones((C,), jnp.float32)
    elif isinstance(alpha, (list, tuple, np.ndarray)):
        a_vec = jnp.asarray(alpha, jnp.float32)
        a_vec = a_vec / a_vec.sum()
    else:
        a_vec = jnp.full((C,), 1.0 - alpha, jnp.float32).at[balance_index].set(alpha)
    oh = jax.nn.one_hot(t, C, dtype=jnp.float32)
    oh = jnp.clip(oh, smooth / (C - 1), 1.0 - smooth)
    pt = jnp.sum(oh * p, axis=1) + smooth
    logpt = jnp.log(pt)
    a = a_vec[t]
    loss = -a * jnp.power(1.0 - pt, gamma) * logpt
    return jnp.mean(loss) if size_average else jnp.sum(loss)


if __name__ == "__main__":
    key = jax.random.PRNGKey(0)
    k1, k2 = jax.random.split(key)

    N, C, H, W = 2, 4, 16, 16
    logit = jax.random.normal(k1, (N, C, H, W), dtype=jnp.float32)
    mask = jax.random.randint(k2, (N, 1, H, W), 0, C, dtype=jnp.int32)

    # Default module config: alpha=None -> ones, gamma=2, smooth=1e-5, size_average=True.
    out = segment_focal_loss(logit, mask)
    out = jax.block_until_ready(out)
    ref = _reference(logit, mask, None)
    assert jnp.allclose(out, ref, rtol=1e-5, atol=1e-5), (out, ref)

    # List-alpha path (normalized per the reference forward).
    alpha_list = [0.1, 0.2, 0.3, 0.4]
    out2 = segment_focal_loss(logit, mask, alpha=alpha_list)
    out2 = jax.block_until_ready(out2)
    ref2 = _reference(logit, mask, alpha_list)
    assert jnp.allclose(out2, ref2, rtol=1e-5, atol=1e-5), (out2, ref2)

    print("KERNEL_OK")
</pallas_src>

<mosaic_0001>
module attributes {stable_mosaic.version = 11 : i64} {
  func.func @_focal_kernel(%arg0: i32, %arg1: i32, %arg2: memref<1x4x8x128xf32, #tpu.memory_space<vmem>>, %arg3: memref<1x1x8x128xi32, #tpu.memory_space<vmem>>, %arg4: memref<1x8x128xf32, #tpu.memory_space<vmem>>) attributes {dimension_semantics = [#tpu.dimension_semantics<parallel>, #tpu.dimension_semantics<arbitrary>], iteration_bounds = array<i64: 2, 1>, scalar_prefetch = 0 : i64, scratch_operands = 0 : i64, tpu.core_type = #tpu.core_type<tc>, window_params = [{transform_indices = @transform_0, window_bounds = array<i64: 1, 4, 8, 128>}, {transform_indices = @transform_1, window_bounds = array<i64: 1, 1, 8, 128>}, {transform_indices = @transform_2, window_bounds = array<i64: 1, 8, 128>}]} {
    %c0_i32 = arith.constant 0 : i32
    %0 = arith.cmpi eq, %arg1, %c0_i32 : i32
    %1 = arith.extui %0 : i1 to i32
    %c0_i32_0 = arith.constant 0 : i32
    %2 = arith.cmpi ne, %1, %c0_i32_0 : i32
    scf.if %2 {
      %cst_24 = arith.constant 0.000000e+00 : f32
      %52 = vector.broadcast %cst_24 : f32 to vector<1x8x128xf32>
      %c0_25 = arith.constant 0 : index
      %c0_26 = arith.constant 0 : index
      %c0_27 = arith.constant 0 : index
      %53 = vector.load %arg4[%c0_25, %c0_26, %c0_27] : memref<1x8x128xf32, #tpu.memory_space<vmem>>, vector<1x8x128xf32>
      tpu.vector_store %arg4[%c0_25, %c0_26, %c0_27], %52 {strides = array<i32>} : memref<1x8x128xf32, #tpu.memory_space<vmem>>, vector<1x8x128xf32>,
    } else {
    }
    %c0 = arith.constant 0 : index
    %c0_1 = arith.constant 0 : index
    %c0_2 = arith.constant 0 : index
    %c0_3 = arith.constant 0 : index
    %3 = vector.load %arg2[%c0, %c0_1, %c0_2, %c0_3] : memref<1x4x8x128xf32, #tpu.memory_space<vmem>>, vector<1x4x8x128xf32>
    %c0_4 = arith.constant 0 : index
    %c0_5 = arith.constant 0 : index
    %c0_6 = arith.constant 0 : index
    %c0_7 = arith.constant 0 : index
    %4 = vector.load %arg3[%c0_4, %c0_5, %c0_6, %c0_7] : memref<1x1x8x128xi32, #tpu.memory_space<vmem>>, vector<1x1x8x128xi32>
    %cst = arith.constant dense<0xFF800000> : vector<1x8x128xf32>
    %5 = vector.multi_reduction <maximumf>, %3, %cst [1] : vector<1x4x8x128xf32> to vector<1x8x128xf32>
    %6 = vector.shape_cast %5 : vector<1x8x128xf32> to vector<1x1x8x128xf32>
    %7 = vector.broadcast %6 : vector<1x1x8x128xf32> to vector<1x4x8x128xf32>
    %8 = arith.subf %3, %7 : vector<1x4x8x128xf32>
    %9 = math.exp %8 : vector<1x4x8x128xf32>
    %cst_8 = arith.constant dense<0.000000e+00> : vector<1x8x128xf32>
    %10 = vector.multi_reduction <add>, %9, %cst_8 [1] : vector<1x4x8x128xf32> to vector<1x8x128xf32>
    %11 = vector.shape_cast %10 : vector<1x8x128xf32> to vector<1x1x8x128xf32>
    %12 = tpu.iota {dimensions = array<i32: 1>} : vector<1x4x8x128xi32>
    %13 = vector.broadcast %4 : vector<1x1x8x128xi32> to vector<1x4x8x128xi32>
    %14 = arith.cmpi eq, %12, %13 : vector<1x4x8x128xi32>
    %cst_9 = arith.constant 0.000000e+00 : f32
    %15 = vector.broadcast %cst_9 : f32 to vector<1x4x8x128xf32>
    %16 = arith.select %14, %9, %15 : vector<1x4x8x128xi1>, vector<1x4x8x128xf32>
    %cst_10 = arith.constant dense<0.000000e+00> : vector<1x8x128xf32>
    %17 = vector.multi_reduction <add>, %16, %cst_10 [1] : vector<1x4x8x128xf32> to vector<1x8x128xf32>
    %18 = vector.shape_cast %17 : vector<1x8x128xf32> to vector<1x1x8x128xf32>
    %19 = tpu.reciprocal %11 : vector<1x1x8x128xf32> -> vector<1x1x8x128xf32>
    %cst_11 = arith.constant 0.999989986 : f32
    %20 = vector.broadcast %cst_11 : f32 to vector<1x1x8x128xf32>
    %21 = arith.mulf %20, %18 : vector<1x1x8x128xf32>
    %22 = arith.subf %11, %18 : vector<1x1x8x128xf32>
    %cst_12 = arith.constant 3.33333332E-6 : f32
    %23 = vector.broadcast %cst_12 : f32 to vector<1x1x8x128xf32>
    %24 = arith.mulf %23, %22 : vector<1x1x8x128xf32>
    %25 = arith.addf %21, %24 : vector<1x1x8x128xf32>
    %26 = arith.mulf %25, %19 : vector<1x1x8x128xf32>
    %cst_13 = arith.constant 9.99999974E-6 : f32
    %27 = vector.broadcast %cst_13 : f32 to vector<1x1x8x128xf32>
    %28 = arith.addf %26, %27 : vector<1x1x8x128xf32>
    %29 = math.log %28 : vector<1x1x8x128xf32>
    %cst_14 = arith.constant 1.000000e+00 : f32
    %30 = vector.broadcast %cst_14 : f32 to vector<1x1x8x128xf32>
    %31 = arith.subf %30, %28 : vector<1x1x8x128xf32>
    %32 = arith.mulf %31, %31 : vector<1x1x8x128xf32>
    %cst_15 = arith.constant -1.000000e+00 : f32
    %33 = vector.broadcast %cst_15 : f32 to vector<1x1x8x128xf32>
    %34 = arith.mulf %33, %32 : vector<1x1x8x128xf32>
    %35 = arith.mulf %34, %29 : vector<1x1x8x128xf32>
    %36 = tpu.iota {dimensions = array<i32: 2>} : vector<1x1x8x128xi32>
    %37 = tpu.iota {dimensions = array<i32: 3>} : vector<1x1x8x128xi32>
    %c8_i32 = arith.constant 8 : i32
    %38 = arith.muli %arg1, %c8_i32 : i32
    %39 = vector.broadcast %38 : i32 to vector<1x1x8x128xi32>
    %40 = arith.addi %39, %36 : vector<1x1x8x128xi32>
    %c128_i32 = arith.constant 128 : i32
    %41 = vector.broadcast %c128_i32 : i32 to vector<1x1x8x128xi32>
    %42 = arith.muli %40, %41 : vector<1x1x8x128xi32>
    %43 = arith.addi %42, %37 : vector<1x1x8x128xi32>
    %c256_i32 = arith.constant 256 : i32
    %44 = vector.broadcast %c256_i32 : i32 to vector<1x1x8x128xi32>
    %45 = arith.cmpi slt, %43, %44 : vector<1x1x8x128xi32>
    %cst_16 = arith.constant 0.000000e+00 : f32
    %46 = vector.broadcast %cst_16 : f32 to vector<1x1x8x128xf32>
    %47 = arith.select %45, %35, %46 : vector<1x1x8x128xi1>, vector<1x1x8x128xf32>
    %cst_17 = arith.constant dense<0.000000e+00> : vector<1x8x128xf32>
    %48 = vector.multi_reduction <add>, %47, %cst_17 [1] : vector<1x1x8x128xf32> to vector<1x8x128xf32>
    %c0_18 = arith.constant 0 : index
    %c0_19 = arith.constant 0 : index
    %c0_20 = arith.constant 0 : index
    %49 = vector.load %arg4[%c0_18, %c0_19, %c0_20] : memref<1x8x128xf32, #tpu.memory_space<vmem>>, vector<1x8x128xf32>
    %50 = arith.addf %49, %48 : vector<1x8x128xf32>
    %c0_21 = arith.constant 0 : index
    %c0_22 = arith.constant 0 : index
    %c0_23 = arith.constant 0 : index
    %51 = vector.load %arg4[%c0_21, %c0_22, %c0_23] : memref<1x8x128xf32, #tpu.memory_space<vmem>>, vector<1x8x128xf32>
    tpu.vector_store %arg4[%c0_21, %c0_22, %c0_23], %50 {strides = array<i32>} : memref<1x8x128xf32, #tpu.memory_space<vmem>>, vector<1x8x128xf32>,
    return
  }
  func.func @transform_0(%arg0: i32, %arg1: i32) -> (i32, i32, i32, i32) {
    %c0_i32 = arith.constant 0 : i32
    %c0_i32_0 = arith.constant 0 : i32
    %c0_i32_1 = arith.constant 0 : i32
    return %arg0, %c0_i32, %arg1, %c0_i32_0 : i32, i32, i32, i32
  }
  func.func @transform_1(%arg0: i32, %arg1: i32) -> (i32, i32, i32, i32) {
    %c0_i32 = arith.constant 0 : i32
    %c0_i32_0 = arith.constant 0 : i32
    %c0_i32_1 = arith.constant 0 : i32
    return %arg0, %c0_i32, %arg1, %c0_i32_0 : i32, i32, i32, i32
  }
  func.func @transform_2(%arg0: i32, %arg1: i32) -> (i32, i32, i32) {
    %c0_i32 = arith.constant 0 : i32
    %c0_i32_0 = arith.constant 0 : i32
    %c0_i32_1 = arith.constant 0 : i32
    return %arg0, %c0_i32, %c0_i32_0 : i32, i32, i32
  }
}

</mosaic_0001>

<bundles_post_ra>
// kernel: _segment_focal_loss_impl.1
= control target key start
LH: loop header
LB: loop body
LE: loop exit
PB: predicated region body
PF: predicated region fallthrough
CT: control target
= control target key end

     0   :  { %s430_s9 = smov 0   ;;  %s432_s10 = smov 0   ;;  %s474_s0 = inlined_call_operand.vmem [shape: f32[2,4,8,128], index: 0, kind: input, shape index: {}]   ;;  %s475_s1 = inlined_call_operand.vmem [shape: s32[2,1,8,128], index: 1, kind: input, shape index: {}]   ;;  %s476_s2 = inlined_call_operand.vmem [shape: f32[2,8,128], index: 2, kind: output, shape index: {}]  }
   0x1   :  { %s434_s11 = smov 0  }
   0x2 LB: > { %s24_s12 = sadd.s32 1, %s409_s10  ;;  %p346_p0 = scmp.ge.s32.totalorder %s413_s11, 1  ;;  %s413_s11 = sphi %s434_s11, %s12_s11   ;;  %s409_s10 = sphi %s432_s10, %s478_s10   ;;  %s405_s9 = sphi %s430_s9, %s477_s9  }
   0x3   : > { %p26_p1 = scmp.ge.s32.totalorder %s24_s12, 2  ;;  %p143_p2 = scmp.lt.s32.totalorder %s413_s11, 3 }
   0x5   : > { %s480_s12 = smov (%p26_p1, %s24_s12), 0  ;;  %p144_p3 = pnand %p346_p0, %p143_p2 }
   0x6   : > { %p174_p4 = scmp.lt.s32.totalorder (!%p144_p3), %s405_s9, 1  ;;  %v245_v36 = vlaneseq (!%p144_p3) }
   0x7   : > { %147 = sbr.rel (%p144_p3) target bundleno = 77 (0x4d), region = 28 }
   0x8   : > { %v246_v38 = vshrl.u32 (!%p144_p3), %v245_v36, 7  ;;  %v248_v40 = vand.u32 (!%p144_p3), 127, %v245_v36 }
   0xa   : > { %v252_v41 = vmul.u32 (!%p144_p3), 128, %v246_v38 }
   0xc   : > { %v253_v43 = vadd.s32 (!%p144_p3), %v252_v41, %v248_v40 }
   0xe   : > { %s482_s9 = smov (!%p174_p4, %s405_s9), 1  ;;  %vm254_vm4 = vcmp.lt.s32.totalorder %v253_v43, 256 }
   0xf   : > { %s353_s13 = sshll.u32 %s482_s9, 5  ;;  %s349_s17 = sshll.u32 %s482_s9, 3 }
  0x10   : > { %s181_s16 = scalar_lea.vmem %s474_s0, %s353_s13  ;;  %s188_s20 = scalar_lea.vmem %s475_s1, %s349_s17 }
  0x11   : > { %v198_v0 = vld [vmem:[%s181_s16] sm:$0xff]  ;;  %v199_v1 = vld [vmem:[%s181_s16 + $0x8] sm:$0xff]  ;;  %v200_v2 = vld [vmem:[%s181_s16 + $0x10] sm:$0xff]  ;;  %s192_s23 = scalar_lea.vmem %s476_s2, %s349_s17 }
  0x12   : > { %v201_v3 = vld [vmem:[%s181_s16 + $0x18] sm:$0xff]  ;;  %v203_v4 = vmax.f32 %v198_v0, %v199_v1  ;;  %v202_v15 = vld [vmem:[%s188_s20] sm:$0xff] }
  0x13   : > { %v204_v5 = vmax.f32 %v200_v2, %v201_v3  ;;  %vm221_vm0 = vcmp.eq.s32.totalorder %v202_v15, 0  ;;  %vm222_vm1 = vcmp.eq.s32.totalorder %v202_v15, 1  ;;  %vm223_vm2 = vcmp.eq.s32.totalorder %v202_v15, 2 }
  0x14   : > { %vm224_vm3 = vcmp.eq.s32.totalorder %v202_v15, 3 }
  0x15   : > { %v205_v6 = vmax.f32 %v203_v4, %v204_v5 }
  0x17   : > { %v206_v7 = vsub.f32 %v198_v0, %v205_v6  ;;  %v207_v8 = vsub.f32 %v199_v1, %v205_v6  ;;  %v208_v9 = vsub.f32 %v200_v2, %v205_v6  ;;  %v209_v10 = vsub.f32 %v201_v3, %v205_v6 }
  0x19   : > { %v210_v11 = vmul.f32 1.442695, %v206_v7  ;;  %v212_v12 = vmul.f32 1.442695, %v207_v8  ;;  %v214_v13 = vmul.f32 1.442695, %v208_v9 }
  0x1a   : > { %v216_v14 = vmul.f32 1.442695, %v209_v10 }
  0x1b   : > { %379 = vpow2.f32 %v210_v11 }
  0x1c   : > { %381 = vpow2.f32 %v212_v12 }
  0x1d   : > { %383 = vpow2.f32 %v214_v13 }
  0x1e   : > { %385 = vpow2.f32 %v216_v14 }
  0x25   : > { %v380_v16 = vpop.eup %379 }
  0x26   : > { %v382_v17 = vpop.eup %381  ;;  %v225_v18 = vsel %vm221_vm0, %v380_v16, 0.0 }
  0x27   : > { %v384_v19 = vpop.eup %383  ;;  %v218_v20 = vadd.f32 %v382_v17, %v380_v16  ;;  %v226_v21 = vsel %vm222_vm1, %v382_v17, 0.0 }
  0x28   : > { %v386_v22 = vpop.eup %385  ;;  %v227_v23 = vsel %vm223_vm2, %v384_v19, 0.0  ;;  %v229_v24 = vadd.f32 %v226_v21, %v225_v18 }
  0x29   : > { %v219_v25 = vadd.f32 %v384_v19, %v218_v20  ;;  %v228_v26 = vsel %vm224_vm3, %v386_v22, 0.0 }
  0x2a   : > { %v230_v27 = vadd.f32 %v229_v24, %v227_v23 }
  0x2b   : > { %v220_v28 = vadd.f32 %v386_v22, %v219_v25 }
  0x2c   : > { %v231_v29 = vadd.f32 %v230_v27, %v228_v26 }
  0x2d   : > { %387 = vrcp.f32 %v220_v28 }
  0x2e   : > { %v234_v30 = vsub.f32 %v220_v28, %v231_v29  ;;  %v233_v31 = vmul.f32 0.99999, %v231_v29 }
  0x30   : > { %v235_v32 = vmul.f32 3.3333333e-06, %v234_v30 }
  0x32   : > { %v236_v33 = vadd.f32 %v235_v32, %v233_v31 }
  0x37   : > { %v388_v34 = vpop.eup %387 }
  0x38   : > { %v237_v35 = vmul.f32 %v388_v34, %v236_v33 }
  0x3a   : > { %v238_v37 = vadd.f32 1e-05, %v237_v35 }
  0x3c   : > { %389 = vlog2.f32 %v238_v37  ;;  %v241_v39 = vsub.f32 1.0, %v238_v37 }
  0x3e   : > { %v242_v42 = vmul.f32 %v241_v39, %v241_v39 }
  0x40   : > { %v243_v44 = vmul.f32 -1.0, %v242_v42 }
  0x46   : > { %v390_v45 = vpop.eup %389 }
  0x47   : > { %v240_v46 = vmul.f32 0.6931472, %v390_v45 }
  0x49   : > { %v244_v47 = vmul.f32 %v243_v44, %v240_v46 }
  0x4b   : > { %v255_v48 = vsel %vm254_vm4, %v244_v47, 0.0 }
  0x4c   : > { %259 = vst [vmem:[%s192_s23] sm:$0xff] %v255_v48 }
  0x4d PF: > { %s12_s11 = sadd.s32 1, %s413_s11   ;;  %s477_s9 = smov %s409_s10 }
  0x4e   : > { %p9_p5 = scmp.ge.s32.totalorder %s12_s11, 4   ;;  %s478_s10 = smov %s480_s12 }
  0x50   :  { %11 = sbr.rel (!%p9_p5) target bundleno = 2 (0x2), region = 65 }

</bundles_post_ra>
